<compile_context>
chip_gen: v7x
topology: tpu7x:2x2x1
jax: 0.10.0
libtpu: 0.0.40
codegen_flags: <defaults>
</compile_context>

<pallas_src>
import functools
import math

import jax
import jax.numpy as jnp
from jax.experimental import pallas as pl
from jax.experimental.pallas import tpu as pltpu

_SMOOTH = 1.0      # SoftDiceLoss default
_LANES = 128


def _round_up(a, b):
    return (a + b - 1) // b * b


def _vmem_capacity_bytes():
    try:
        info = pltpu.get_tpu_info()
        cap = getattr(info, "vmem_capacity_bytes", None)
        if cap:
            return int(cap)
    except Exception:
        pass
    return 64 * 1024 * 1024          # conservative (v7x-sized) fallback


def _soft_dice_kernel(x_ref, y_ref, o_ref, tp_acc, sx_acc, cnt_acc, *,
                      apply_softmax, rows, tr, tiles_per_split, ragged):
    s = pl.program_id(2)
    n_s = pl.num_programs(2)

    @pl.when(s == 0)
    def _init():
        tp_acc[...] = jnp.zeros_like(tp_acc)
        sx_acc[...] = jnp.zeros_like(sx_acc)
        cnt_acc[...] = jnp.zeros_like(cnt_acc)

    x = x_ref[...]                                   # (1, C, tr, 128), input dtype
    y = y_ref[...]                                   # (1, 1, tr, 128), int32 labels (-1 = pad)
    C = x.shape[1]

    xf = x.astype(jnp.float32)                       # widen in vregs; accum stays f32
    if apply_softmax:                                # fused apply_nonlin = softmax(dim=1)
        m = jnp.max(xf, axis=1, keepdims=True)
        e = jnp.exp(xf - m)
        xf = e * pl.reciprocal(jnp.sum(e, axis=1, keepdims=True), approx=True)

    # one-hot mask from a tiny per-channel iota; == broadcasts it over (tr, 128)
    ch = jax.lax.broadcasted_iota(y.dtype, (1, C, 1, x.shape[3]), 1)
    hit = (y == ch)                                  # (1, C, tr, 128)

    if ragged:
        # ragged last row-tile (and fully-out-of-range tiles of the TC split):
        # zero out rows >= rows using the *logical* tile index.
        tile_idx = pl.program_id(1) * tiles_per_split + s
        row_ids = jax.lax.broadcasted_iota(jnp.int32, (1, 1, tr, 1), 2)
        row_ok = (row_ids + tile_idx * tr) < rows
        xf = jnp.where(row_ok, xf, 0.0)
        hit = jnp.logical_and(hit, row_ok)

    # partial spatial reduction over the sublane (tr) axis; lanes reduced at finalize
    tp_acc[...] += jnp.sum(jnp.where(hit, xf, 0.0), axis=2)       # (1, C, 128)
    sx_acc[...] += jnp.sum(xf, axis=2)                            # (1, C, 128)
    cnt_acc[...] += jnp.sum(hit.astype(jnp.float32), axis=2)      # (1, C, 128)

    @pl.when(s == n_s - 1)
    def _finalize():
        C_ = tp_acc.shape[1]
        o_ref[:, :, 0, :] = jnp.sum(tp_acc[...], axis=-1).reshape(1, 1, C_)
        o_ref[:, :, 1, :] = jnp.sum(sx_acc[...], axis=-1).reshape(1, 1, C_)
        o_ref[:, :, 2, :] = jnp.sum(cnt_acc[...], axis=-1).reshape(1, 1, C_)


def soft_dice_loss(x, y, *, apply_softmax=False, smooth=_SMOOTH,
                   max_block_bytes=None):
    """SoftDiceLoss forward (batch_dice=False, do_bg=True, clip_tp=None).

    x: (B, C, *spatial) float probabilities (logits if apply_softmax=True).
    y: (B, 1, *spatial) or (B, *spatial) integer label map.
    """
    # TODO(synk): loss_mask, pre-one-hot gt inputs, clip_tp and the
    # batch_dice(+ddp AllGatherGrad) branches of the module are not implemented.
    B, C = x.shape[0], x.shape[1]
    S = math.prod(x.shape[2:])
    if not jnp.issubdtype(x.dtype, jnp.floating):
        x = x.astype(jnp.float32)
    x_flat = x.reshape(B, C, S)                      # keep f32/bf16 as-is (no forced upcast)
    y_flat = y.reshape(B, S)
    if y_flat.dtype != jnp.int32:
        y_flat = y_flat.astype(jnp.int32)            # labels stream as int32 (tiny vs x)

    # Pad only to the next 128-lane multiple (no-op for typical aligned volumes).
    # Pad labels with -1 (never matches a channel), x with zeros.
    s128 = _round_up(S, _LANES)
    lane_pad = s128 - S
    if lane_pad:
        x_flat = jnp.pad(x_flat, ((0, 0), (0, 0), (0, lane_pad)))
        y_flat = jnp.pad(y_flat, ((0, 0), (0, lane_pad)), constant_values=-1)
    rows = s128 // _LANES
    x4 = x_flat.reshape(B, C, rows, _LANES)
    y4 = y_flat.reshape(B, 1, rows, _LANES)

    # Generation-aware tile / VMEM budget.
    vmem_cap = _vmem_capacity_bytes()
    big_vmem = vmem_cap >= 96 * 1024 * 1024          # v5e / v6e (128 MiB) vs v7x (64 MiB)
    itemsize = jnp.dtype(x_flat.dtype).itemsize
    target = max_block_bytes or ((8 if big_vmem else 4) * 1024 * 1024)
    vmem_limit = (64 if big_vmem else 32) * 1024 * 1024

    tr_budget = max(1, target // (C * _LANES * itemsize))
    if rows <= tr_budget:
        tr = rows                                    # single tile (equals full dim)
    else:
        tr = min(rows, max(32, (tr_budget // 32) * 32))
    num_s = -(-rows // tr)

    # Split the spatial reduction across TensorCores when the batch axis alone
    # would leave a v7x core idle / unbalanced (odd B).  Harmless on 1-TC chips.
    nsplit = 2 if (B % 2 == 1 and num_s >= 2) else 1
    tiles_per_split = -(-num_s // nsplit)
    ragged = (nsplit * tiles_per_split * tr) != rows

    def _row_map(b, p, s):
        # clamp so no DMA ever targets a nonexistent block; the kernel masks the
        # duplicated / partial rows using the *logical* index p*tiles_per_split+s.
        t = jnp.minimum(p * tiles_per_split + s, num_s - 1)
        return (b, 0, t, 0)

    kernel = functools.partial(
        _soft_dice_kernel, apply_softmax=apply_softmax, rows=rows, tr=tr,
        tiles_per_split=tiles_per_split, ragged=ragged)

    parts = pl.pallas_call(
        kernel,
        out_shape=jax.ShapeDtypeStruct((B, nsplit, 3, C), jnp.float32),
        grid_spec=pltpu.PrefetchScalarGridSpec(
            num_scalar_prefetch=0,
            grid=(B, nsplit, tiles_per_split),
            in_specs=[
                pl.BlockSpec((1, C, tr, _LANES), _row_map),
                pl.BlockSpec((1, 1, tr, _LANES), _row_map),
            ],
            out_specs=pl.BlockSpec((1, 1, 3, C), lambda b, p, s: (b, p, 0, 0)),
            scratch_shapes=[
                pltpu.VMEM((1, C, _LANES), jnp.float32),   # tp per-lane partials
                pltpu.VMEM((1, C, _LANES), jnp.float32),   # sum_x per-lane partials
                pltpu.VMEM((1, C, _LANES), jnp.float32),   # one-hot count partials
            ],
        ),
        compiler_params=pltpu.CompilerParams(
            dimension_semantics=("parallel", "parallel", "arbitrary"),
            vmem_limit_bytes=vmem_limit,
        ),
    )(x4, y4)                                        # (B, nsplit, 3, C)

    totals = jnp.sum(parts, axis=1)                  # (B, 3, C)
    tp, sx, cnt = totals[:, 0, :], totals[:, 1, :], totals[:, 2, :]
    if apply_softmax and lane_pad:
        # zero-logit padded lanes softmax to exactly 1/C per channel (pad labels
        # are -1 so tp / cnt are unaffected) -> constant correction on sum_x.
        sx = sx - lane_pad / C
    # fp = sx - tp, fn = cnt - tp  =>  2*tp + fp + fn = sx + cnt
    dc = (2.0 * tp + smooth) / jnp.maximum(sx + cnt + smooth, 1e-8)
    return -jnp.mean(dc)                             # do_bg=True, batch_dice=False


def _reference(x, y, *, smooth=_SMOOTH):
    # Pure-JAX reference mirroring the PyTorch forward (apply_nonlin=None).
    B, C = x.shape[0], x.shape[1]
    spatial = x.shape[2:]
    y_onehot = jax.nn.one_hot(y.reshape(B, *spatial), C, axis=1, dtype=jnp.float32)
    xf = x.astype(jnp.float32)
    axes = tuple(range(2, xf.ndim))
    tp = jnp.sum(xf * y_onehot, axis=axes)
    fp = jnp.sum(xf * (1.0 - y_onehot), axis=axes)
    fn = jnp.sum((1.0 - xf) * y_onehot, axis=axes)
    dc = (2.0 * tp + smooth) / jnp.clip(2.0 * tp + fp + fn + smooth, 1e-8)
    return -jnp.mean(dc)


if __name__ == "__main__":
    key = jax.random.PRNGKey(0)
    k1, k2, k3, k4 = jax.random.split(key, 4)

    # 1) default module semantics: apply_nonlin=None (x already probabilities)
    B, C, H, W = 2, 4, 16, 16
    logits = jax.random.normal(k1, (B, C, H, W), dtype=jnp.float32)
    probs = jax.nn.softmax(logits, axis=1)
    y = jax.random.randint(k2, (B, 1, H, W), 0, C, dtype=jnp.int32)
    loss = soft_dice_loss(probs, y)
    jax.block_until_ready(loss)
    ref = _reference(probs, y)
    assert jnp.allclose(loss, ref, atol=1e-5, rtol=1e-5), (loss, ref)

    # 2) fused channel-softmax (apply_nonlin folded into the kernel); looser
    #    tolerance because of the approximate EUP reciprocal.
    loss_fused = soft_dice_loss(logits, y, apply_softmax=True)
    jax.block_until_ready(loss_fused)
    assert jnp.allclose(loss_fused, ref, atol=1e-2, rtol=1e-2), (loss_fused, ref)

    # 3) odd batch -> TensorCore-split reduction + ragged row-tiles (small forced
    #    block so the multi-tile / masked path is exercised at test shapes)
    B2, C2, H2, W2 = 1, 3, 96, 96
    logits2 = jax.random.normal(k3, (B2, C2, H2, W2), dtype=jnp.float32)
    probs2 = jax.nn.softmax(logits2, axis=1)
    y2 = jax.random.randint(k4, (B2, 1, H2, W2), 0, C2, dtype=jnp.int32)
    loss2 = soft_dice_loss(probs2, y2, max_block_bytes=64 * 1024)
    jax.block_until_ready(loss2)
    ref2 = _reference(probs2, y2)
    assert jnp.allclose(loss2, ref2, atol=1e-5, rtol=1e-5), (loss2, ref2)

    # 4) non-128-aligned spatial size + fused softmax (lane-pad correction path)
    B3, C3, H3, W3 = 2, 4, 10, 10
    logits3 = jax.random.normal(k1, (B3, C3, H3, W3), dtype=jnp.float32)
    y3 = jax.random.randint(k2, (B3, 1, H3, W3), 0, C3, dtype=jnp.int32)
    loss3 = soft_dice_loss(logits3, y3, apply_softmax=True)
    jax.block_until_ready(loss3)
    ref3 = _reference(jax.nn.softmax(logits3, axis=1), y3)
    assert jnp.allclose(loss3, ref3, atol=1e-2, rtol=1e-2), (loss3, ref3)

    print("KERNEL_OK")
</pallas_src>

<mosaic_0001>
module attributes {stable_mosaic.version = 11 : i64} {
  func.func @_soft_dice_kernel(%arg0: i32, %arg1: i32, %arg2: i32, %arg3: memref<1x4x2x128xf32, #tpu.memory_space<vmem>>, %arg4: memref<1x1x2x128xi32, #tpu.memory_space<vmem>>, %arg5: memref<1x1x3x4xf32, #tpu.memory_space<vmem>>, %arg6: memref<1x4x128xf32, #tpu.memory_space<vmem>>, %arg7: memref<1x4x128xf32, #tpu.memory_space<vmem>>, %arg8: memref<1x4x128xf32, #tpu.memory_space<vmem>>) attributes {dimension_semantics = [#tpu.dimension_semantics<parallel>, #tpu.dimension_semantics<parallel>, #tpu.dimension_semantics<arbitrary>], iteration_bounds = array<i64: 2, 1, 1>, scalar_prefetch = 0 : i64, scratch_operands = 3 : i64, tpu.core_type = #tpu.core_type<tc>, window_params = [{transform_indices = @transform_0, window_bounds = array<i64: 1, 4, 2, 128>}, {transform_indices = @transform_1, window_bounds = array<i64: 1, 1, 2, 128>}, {transform_indices = @transform_2, window_bounds = array<i64: 1, 1, 3, 4>}]} {
    %c0_i32 = arith.constant 0 : i32
    %0 = arith.cmpi eq, %arg2, %c0_i32 : i32
    %1 = arith.extui %0 : i1 to i32
    %c0_i32_0 = arith.constant 0 : i32
    %2 = arith.cmpi ne, %1, %c0_i32_0 : i32
    scf.if %2 {
      %cst_31 = arith.constant 0.000000e+00 : f32
      %28 = vector.broadcast %cst_31 : f32 to vector<1x4x128xf32>
      %c0_32 = arith.constant 0 : index
      %c0_33 = arith.constant 0 : index
      %c0_34 = arith.constant 0 : index
      %29 = vector.load %arg6[%c0_32, %c0_33, %c0_34] : memref<1x4x128xf32, #tpu.memory_space<vmem>>, vector<1x4x128xf32>
      tpu.vector_store %arg6[%c0_32, %c0_33, %c0_34], %28 {strides = array<i32>} : memref<1x4x128xf32, #tpu.memory_space<vmem>>, vector<1x4x128xf32>,
      %cst_35 = arith.constant 0.000000e+00 : f32
      %30 = vector.broadcast %cst_35 : f32 to vector<1x4x128xf32>
      %c0_36 = arith.constant 0 : index
      %c0_37 = arith.constant 0 : index
      %c0_38 = arith.constant 0 : index
      %31 = vector.load %arg7[%c0_36, %c0_37, %c0_38] : memref<1x4x128xf32, #tpu.memory_space<vmem>>, vector<1x4x128xf32>
      tpu.vector_store %arg7[%c0_36, %c0_37, %c0_38], %30 {strides = array<i32>} : memref<1x4x128xf32, #tpu.memory_space<vmem>>, vector<1x4x128xf32>,
      %cst_39 = arith.constant 0.000000e+00 : f32
      %32 = vector.broadcast %cst_39 : f32 to vector<1x4x128xf32>
      %c0_40 = arith.constant 0 : index
      %c0_41 = arith.constant 0 : index
      %c0_42 = arith.constant 0 : index
      %33 = vector.load %arg8[%c0_40, %c0_41, %c0_42] : memref<1x4x128xf32, #tpu.memory_space<vmem>>, vector<1x4x128xf32>
      tpu.vector_store %arg8[%c0_40, %c0_41, %c0_42], %32 {strides = array<i32>} : memref<1x4x128xf32, #tpu.memory_space<vmem>>, vector<1x4x128xf32>,
    } else {
    }
    %c0 = arith.constant 0 : index
    %c0_1 = arith.constant 0 : index
    %c0_2 = arith.constant 0 : index
    %c0_3 = arith.constant 0 : index
    %3 = vector.load %arg3[%c0, %c0_1, %c0_2, %c0_3] : memref<1x4x2x128xf32, #tpu.memory_space<vmem>>, vector<1x4x2x128xf32>
    %c0_4 = arith.constant 0 : index
    %c0_5 = arith.constant 0 : index
    %c0_6 = arith.constant 0 : index
    %c0_7 = arith.constant 0 : index
    %4 = vector.load %arg4[%c0_4, %c0_5, %c0_6, %c0_7] : memref<1x1x2x128xi32, #tpu.memory_space<vmem>>, vector<1x1x2x128xi32>
    %5 = tpu.iota {dimensions = array<i32: 1>} : vector<1x4x1x128xi32>
    %6 = vector.broadcast %4 : vector<1x1x2x128xi32> to vector<1x4x2x128xi32>
    %7 = vector.broadcast %5 : vector<1x4x1x128xi32> to vector<1x4x2x128xi32>
    %8 = arith.cmpi eq, %6, %7 : vector<1x4x2x128xi32>
    %c0_8 = arith.constant 0 : index
    %c0_9 = arith.constant 0 : index
    %c0_10 = arith.constant 0 : index
    %9 = vector.load %arg6[%c0_8, %c0_9, %c0_10] : memref<1x4x128xf32, #tpu.memory_space<vmem>>, vector<1x4x128xf32>
    %cst = arith.constant 0.000000e+00 : f32
    %10 = vector.broadcast %cst : f32 to vector<1x4x2x128xf32>
    %11 = arith.select %8, %3, %10 : vector<1x4x2x128xi1>, vector<1x4x2x128xf32>
    %cst_11 = arith.constant dense<0.000000e+00> : vector<1x4x128xf32>
    %12 = vector.multi_reduction <add>, %11, %cst_11 [2] : vector<1x4x2x128xf32> to vector<1x4x128xf32>
    %13 = arith.addf %9, %12 : vector<1x4x128xf32>
    %c0_12 = arith.constant 0 : index
    %c0_13 = arith.constant 0 : index
    %c0_14 = arith.constant 0 : index
    %14 = vector.load %arg6[%c0_12, %c0_13, %c0_14] : memref<1x4x128xf32, #tpu.memory_space<vmem>>, vector<1x4x128xf32>
    tpu.vector_store %arg6[%c0_12, %c0_13, %c0_14], %13 {strides = array<i32>} : memref<1x4x128xf32, #tpu.memory_space<vmem>>, vector<1x4x128xf32>,
    %c0_15 = arith.constant 0 : index
    %c0_16 = arith.constant 0 : index
    %c0_17 = arith.constant 0 : index
    %15 = vector.load %arg7[%c0_15, %c0_16, %c0_17] : memref<1x4x128xf32, #tpu.memory_space<vmem>>, vector<1x4x128xf32>
    %cst_18 = arith.constant dense<0.000000e+00> : vector<1x4x128xf32>
    %16 = vector.multi_reduction <add>, %3, %cst_18 [2] : vector<1x4x2x128xf32> to vector<1x4x128xf32>
    %17 = arith.addf %15, %16 : vector<1x4x128xf32>
    %c0_19 = arith.constant 0 : index
    %c0_20 = arith.constant 0 : index
    %c0_21 = arith.constant 0 : index
    %18 = vector.load %arg7[%c0_19, %c0_20, %c0_21] : memref<1x4x128xf32, #tpu.memory_space<vmem>>, vector<1x4x128xf32>
    tpu.vector_store %arg7[%c0_19, %c0_20, %c0_21], %17 {strides = array<i32>} : memref<1x4x128xf32, #tpu.memory_space<vmem>>, vector<1x4x128xf32>,
    %c0_22 = arith.constant 0 : index
    %c0_23 = arith.constant 0 : index
    %c0_24 = arith.constant 0 : index
    %19 = vector.load %arg8[%c0_22, %c0_23, %c0_24] : memref<1x4x128xf32, #tpu.memory_space<vmem>>, vector<1x4x128xf32>
    %20 = arith.extui %8 : vector<1x4x2x128xi1> to vector<1x4x2x128xi32>
    %21 = arith.sitofp %20 : vector<1x4x2x128xi32> to vector<1x4x2x128xf32>
    %cst_25 = arith.constant dense<0.000000e+00> : vector<1x4x128xf32>
    %22 = vector.multi_reduction <add>, %21, %cst_25 [2] : vector<1x4x2x128xf32> to vector<1x4x128xf32>
    %23 = arith.addf %19, %22 : vector<1x4x128xf32>
    %c0_26 = arith.constant 0 : index
    %c0_27 = arith.constant 0 : index
    %c0_28 = arith.constant 0 : index
    %24 = vector.load %arg8[%c0_26, %c0_27, %c0_28] : memref<1x4x128xf32, #tpu.memory_space<vmem>>, vector<1x4x128xf32>
    tpu.vector_store %arg8[%c0_26, %c0_27, %c0_28], %23 {strides = array<i32>} : memref<1x4x128xf32, #tpu.memory_space<vmem>>, vector<1x4x128xf32>,
    %c0_i32_29 = arith.constant 0 : i32
    %25 = arith.cmpi eq, %arg2, %c0_i32_29 : i32
    %26 = arith.extui %25 : i1 to i32
    %c0_i32_30 = arith.constant 0 : i32
    %27 = arith.cmpi ne, %26, %c0_i32_30 : i32
    scf.if %27 {
      %c0_31 = arith.constant 0 : index
      %c0_32 = arith.constant 0 : index
      %c0_33 = arith.constant 0 : index
      %28 = vector.load %arg6[%c0_31, %c0_32, %c0_33] : memref<1x4x128xf32, #tpu.memory_space<vmem>>, vector<1x4x128xf32>
      %cst_34 = arith.constant dense<0.000000e+00> : vector<1x4xf32>
      %29 = vector.multi_reduction <add>, %28, %cst_34 [2] : vector<1x4x128xf32> to vector<1x4xf32>
      %30 = vector.shape_cast %29 : vector<1x4xf32> to vector<1x1x4xf32>
      %c0_35 = arith.constant 0 : index
      %c0_36 = arith.constant 0 : index
      %c0_37 = arith.constant 0 : index
      %c0_38 = arith.constant 0 : index
      %31 = vector.load %arg5[%c0_35, %c0_36, %c0_37, %c0_38] : memref<1x1x3x4xf32, #tpu.memory_space<vmem>>, vector<1x1x1x4xf32>
      %32 = vector.shape_cast %31 : vector<1x1x1x4xf32> to vector<1x1x4xf32>
      %33 = vector.shape_cast %30 : vector<1x1x4xf32> to vector<1x1x1x4xf32>
      tpu.vector_store %arg5[%c0_35, %c0_36, %c0_37, %c0_38], %33 {strides = array<i32>} : memref<1x1x3x4xf32, #tpu.memory_space<vmem>>, vector<1x1x1x4xf32>,
      %c0_39 = arith.constant 0 : index
      %c0_40 = arith.constant 0 : index
      %c0_41 = arith.constant 0 : index
      %34 = vector.load %arg7[%c0_39, %c0_40, %c0_41] : memref<1x4x128xf32, #tpu.memory_space<vmem>>, vector<1x4x128xf32>
      %cst_42 = arith.constant dense<0.000000e+00> : vector<1x4xf32>
      %35 = vector.multi_reduction <add>, %34, %cst_42 [2] : vector<1x4x128xf32> to vector<1x4xf32>
      %36 = vector.shape_cast %35 : vector<1x4xf32> to vector<1x1x4xf32>
      %c0_43 = arith.constant 0 : index
      %c0_44 = arith.constant 0 : index
      %c1 = arith.constant 1 : index
      %c0_45 = arith.constant 0 : index
      %37 = vector.load %arg5[%c0_43, %c0_44, %c1, %c0_45] : memref<1x1x3x4xf32, #tpu.memory_space<vmem>>, vector<1x1x1x4xf32>
      %38 = vector.shape_cast %37 : vector<1x1x1x4xf32> to vector<1x1x4xf32>
      %39 = vector.shape_cast %36 : vector<1x1x4xf32> to vector<1x1x1x4xf32>
      tpu.vector_store %arg5[%c0_43, %c0_44, %c1, %c0_45], %39 {strides = array<i32>} : memref<1x1x3x4xf32, #tpu.memory_space<vmem>>, vector<1x1x1x4xf32>,
      %c0_46 = arith.constant 0 : index
      %c0_47 = arith.constant 0 : index
      %c0_48 = arith.constant 0 : index
      %40 = vector.load %arg8[%c0_46, %c0_47, %c0_48] : memref<1x4x128xf32, #tpu.memory_space<vmem>>, vector<1x4x128xf32>
      %cst_49 = arith.constant dense<0.000000e+00> : vector<1x4xf32>
      %41 = vector.multi_reduction <add>, %40, %cst_49 [2] : vector<1x4x128xf32> to vector<1x4xf32>
      %42 = vector.shape_cast %41 : vector<1x4xf32> to vector<1x1x4xf32>
      %c0_50 = arith.constant 0 : index
      %c0_51 = arith.constant 0 : index
      %c2 = arith.constant 2 : index
      %c0_52 = arith.constant 0 : index
      %43 = vector.load %arg5[%c0_50, %c0_51, %c2, %c0_52] : memref<1x1x3x4xf32, #tpu.memory_space<vmem>>, vector<1x1x1x4xf32>
      %44 = vector.shape_cast %43 : vector<1x1x1x4xf32> to vector<1x1x4xf32>
      %45 = vector.shape_cast %42 : vector<1x1x4xf32> to vector<1x1x1x4xf32>
      tpu.vector_store %arg5[%c0_50, %c0_51, %c2, %c0_52], %45 {strides = array<i32>} : memref<1x1x3x4xf32, #tpu.memory_space<vmem>>, vector<1x1x1x4xf32>,
    } else {
    }
    return
  }
  func.func @transform_0(%arg0: i32, %arg1: i32, %arg2: i32) -> (i32, i32, i32, i32) {
    %c1_i32 = arith.constant 1 : i32
    %0 = arith.muli %arg1, %c1_i32 : i32
    %1 = arith.addi %0, %arg2 : i32
    %c0_i32 = arith.constant 0 : i32
    %2 = arith.minsi %1, %c0_i32 : i32
    %c0_i32_0 = arith.constant 0 : i32
    %c0_i32_1 = arith.constant 0 : i32
    %c0_i32_2 = arith.constant 0 : i32
    return %arg0, %c0_i32_0, %2, %c0_i32_1 : i32, i32, i32, i32
  }
  func.func @transform_1(%arg0: i32, %arg1: i32, %arg2: i32) -> (i32, i32, i32, i32) {
    %c1_i32 = arith.constant 1 : i32
    %0 = arith.muli %arg1, %c1_i32 : i32
    %1 = arith.addi %0, %arg2 : i32
    %c0_i32 = arith.constant 0 : i32
    %2 = arith.minsi %1, %c0_i32 : i32
    %c0_i32_0 = arith.constant 0 : i32
    %c0_i32_1 = arith.constant 0 : i32
    %c0_i32_2 = arith.constant 0 : i32
    return %arg0, %c0_i32_0, %2, %c0_i32_1 : i32, i32, i32, i32
  }
  func.func @transform_2(%arg0: i32, %arg1: i32, %arg2: i32) -> (i32, i32, i32, i32) {
    %c0_i32 = arith.constant 0 : i32
    %c0_i32_0 = arith.constant 0 : i32
    %c0_i32_1 = arith.constant 0 : i32
    return %arg0, %arg1, %c0_i32, %c0_i32_0 : i32, i32, i32, i32
  }
}

</mosaic_0001>

<bundles_post_ra>
// kernel: tpu_custom_call.1
= control target key start
LH: loop header
LB: loop body
LE: loop exit
PB: predicated region body
PF: predicated region fallthrough
CT: control target
= control target key end

     0   :  { %7 = vsyncpa [#allocation6], 0  ;;  %s988_s0 = inlined_call_operand.hbm [shape: f32[2,4,2,128], index: 0, kind: input, shape index: {}]   ;;  %s989_s1 = inlined_call_operand.hbm [shape: s32[2,1,2,128], index: 1, kind: input, shape index: {}]   ;;  %s990_s2 = inlined_call_operand.vmem [shape: f32[2,1,3,4], index: 2, kind: output, shape index: {}]  }
   0x1   :  { %9 = vsyncpa [#allocation6 + $0x1], 0 }
   0x2   :  { %10 = vsyncpa [#allocation8], 0 }
   0x3   :  { %12 = vsyncpa [#allocation8 + $0x1], 0  ;;  %s776_s9 = smov 0   ;;  %s778_s10 = smov 0  }
   0x4   :  { %s780_s11 = smov 0   ;;  %s782_s12 = smov 0  }
   0x5   :  { %s784_s13 = smov 0   ;;  %s786_s14 = smov 0  }
   0x6 LB: > { %s557_s15 = sadd.s32 4294967295, %s754_s14   ;;  %s37_s16 = sadd.s32 1, %s750_s13  ;;  %s754_s14 = sphi %s786_s14, %s18_s14   ;;  %s750_s13 = sphi %s784_s13, %s1002_s13   ;;  %s746_s12 = sphi %s782_s12, %s1001_s12   ;;  %s742_s11 = sphi %s780_s11, %s1000_s11   ;;  %s738_s10 = sphi %s778_s10, %s999_s10   ;;  %s734_s9 = sphi %s776_s9, %s998_s9  }
   0x7   : > { %p39_p0 = scmp.ge.s32.totalorder %s37_s16, 2  ;;  %s52_s17 = sadd.s32 1, %s742_s11 }
   0x8   : > { %p59_p1 = scmp.ne.s32.totalorder %s742_s11, %s738_s10  ;;  %p60_p2 = scmp.eq.s32.totalorder %s754_s14, 0 }
   0x9   : > { %s1004_s16 = smov (%p39_p0, %s37_s16), 0  ;;  %p65_p4 = scmp.ne.s32.totalorder %s738_s10, %s734_s9 }
   0xa   : > { %p812_p3 = por %p60_p2, %p59_p1  ;;  %s47_s19 = ssub.s32 %s750_s13, %s1004_s16 }
   0xb   : > { %p66_p5 = scmp.eq.s32.totalorder %s557_s15, 0  ;;  %p50_p6 = scmp.eq.s32.totalorder %s47_s19, 0 }
   0xc   : > { %p588_p8 = scmp.lt.s32.totalorder %s754_s14, 2  ;;  %s828_s22 = sand.u32 1, %s742_s11  }
   0xd   : > { %p819_p7 = por %p66_p5, %p65_p4  ;;  %s576_s23 = sshll.u32 %s750_s13, 7 }
   0xe   : > { %s825_s21 = scalar_select %p50_p6, %s742_s11, %s52_s17  }
   0xf   : > { %s993_s20 = scalar_select %p819_p7, 1, 0 }
  0x10   : > { %s561_s24 = sshll.u32 %s828_s22, 3  ;;  %s835_s27 = scalar_lea.hbm %s988_s0, %s576_s23 }
  0x11   : > { %s155_s28 = scalar_lea.vmem [#allocation5], %s561_s24  ;;  %p839_p9 = pnand %p588_p8, %p812_p3 }
  0x12   : > { %s166_s29 = sshll.u32 %s155_s28, 4  ;;  %s152_s3 = scalar_lea.sflag [#allocation6], %s828_s22  ;;  %s843_s29 = int_to_ptr.vmem [resolvable:$true] %s166_s29 }
  0x13   : > { %s640_s4 = scalar_lea.hbm %s835_s27, 128  ;;  %p642_p11 = pneg %p839_p9 }
  0x14   : > { %p641_p10 = scmp.ne.s32.totalorder %s835_s27, %s640_s4  ;;  %s645_s7 = scalar_lea.hbm %s988_s0, 256 }
  0x15   : > { %p646_p0 = scmp.lt.u32.totalorder %s835_s27, %s988_s0  ;;  %p647_p1 = scmp.lt.u32.totalorder %s645_s7, %s640_s4 }
  0x16   : > { %p643_p12 = pnand %p642_p11, %p641_p10  ;;  %p649_p3 = scmp.lt.u32.totalorder %s640_s4, %s835_s27 }
  0x17   : > { %p648_p2 = por %p647_p1, %p646_p0 }
  0x18   : > { %p644_p13 = pneg %p643_p12 }
  0x19   : > { %p650_p4 = por %p649_p3, %p648_p2 }
  0x1b   : > { %p651_p5 = pnand %p650_p4, %p644_p13 }
  0x1d   : > { %654 = shalt.err (!%p651_p5)
}
  0x1e   : > { %s655_s15 = scalar_lea.vmem %s843_s29, 128  ;;  %s756_s17 = smov [#allocation5]  }
  0x1f   : > { %p656_p6 = scmp.ne.s32.totalorder %s843_s29, %s655_s15  ;;  %s660_s18 = sshll.u32 %s756_s17, 4  ;;  %s661_s18 = int_to_ptr.vmem [resolvable:$false] %s660_s18 }
  0x20   : > { %s662_s19 = scalar_lea.vmem %s661_s18, 256  ;;  %p663_p12 = scmp.lt.s32.totalorder %s843_s29, %s661_s18 }
  0x21   : > { %p658_p8 = pnand %p656_p6, %p642_p11  ;;  %p664_p0 = scmp.lt.s32.totalorder %s662_s19, %s655_s15 }
  0x23   : > { %p659_p10 = pneg %p658_p8  ;;  %p665_p1 = por %p664_p0, %p663_p12 }
  0x25   : > { %p666_p2 = pnand %p665_p1, %p659_p10 }
  0x27   : > { %669 = shalt.err (!%p666_p2)
}
  0x28   : > { %s757_s23 = smov 32   ;;  %s758_s24 = smov 2  }
  0x29   : > { %584 = dma.hbm_to_vmem [thread:$0]  (!%p839_p9), %s835_s27, 128, %s843_s29, %s152_s3, %s757_s23, %s757_s23, %s758_s24  }
  0x2a   : > { %p566_p13 = scmp.ge.s32.totalorder %s754_s14, 1  ;;  %p196_p3 = scmp.lt.s32.totalorder %s754_s14, 3 }
  0x2b   : > { %s564_s25 = sshll.u32 %s828_s22, 1  ;;  %s565_s28 = sshll.u32 %s750_s13, 5 }
  0x2c   : > { %p876_p4 = pnand %p566_p13, %p196_p3  ;;  %s180_s4 = scalar_lea.vmem [#allocation7], %s564_s25 }
  0x2d   : > { %s191_s5 = sshll.u32 %s180_s4, 4  ;;  %s884_s8 = scalar_lea.hbm %s989_s1, %s565_s28  ;;  %s192_s5 = int_to_ptr.vmem [resolvable:$true] %s191_s5 }
  0x2e   : > { %s995_s26 = scalar_select %p876_p4, 1, 0 }
  0x2f   : > { %s177_s27 = scalar_lea.sflag [#allocation8], %s828_s22  ;;  %s670_s29 = scalar_lea.hbm %s884_s8, 32 }
  0x30   : > { %p671_p5 = scmp.ne.s32.totalorder %s884_s8, %s670_s29  ;;  %s675_s15 = scalar_lea.hbm %s989_s1, 64 }
  0x31   : > { %p676_p10 = scmp.lt.u32.totalorder %s884_s8, %s989_s1  ;;  %p677_p12 = scmp.lt.u32.totalorder %s675_s15, %s670_s29 }
  0x32   : > { %p673_p6 = pnand %p671_p5, %p642_p11  ;;  %p679_p1 = scmp.lt.u32.totalorder %s670_s29, %s884_s8 }
  0x33   : > { %p678_p0 = por %p677_p12, %p676_p10 }
  0x34   : > { %p674_p8 = pneg %p673_p6 }
  0x35   : > { %p680_p2 = por %p679_p1, %p678_p0 }
  0x37   : > { %p681_p13 = pnand %p680_p2, %p674_p8 }
  0x39   : > { %684 = shalt.err (!%p681_p13)
}
  0x3a   : > { %s685_s22 = scalar_lea.vmem %s192_s5, 32  ;;  %s759_s19 = smov [#allocation7]  }
  0x3b   : > { %p686_p3 = scmp.ne.s32.totalorder %s192_s5, %s685_s22  ;;  %s690_s23 = sshll.u32 %s759_s19, 4  ;;  %s691_s23 = int_to_ptr.vmem [resolvable:$false] %s690_s23 }
  0x3c   : > { %s692_s24 = scalar_lea.vmem %s691_s23, 64  ;;  %p693_p7 = scmp.lt.s32.totalorder %s192_s5, %s691_s23 }
  0x3d   : > { %p688_p5 = pnand %p686_p3, %p642_p11  ;;  %p694_p4 = scmp.lt.s32.totalorder %s692_s24, %s685_s22 }
  0x3f   : > { %p689_p6 = pneg %p688_p5  ;;  %p695_p10 = por %p694_p4, %p693_p7 }
  0x41   : > { %p696_p12 = pnand %p695_p10, %p689_p6 }
  0x43   : > { %699 = shalt.err (!%p696_p12)
}
  0x44   : > { %587 = dma.hbm_to_vmem [thread:$0]  (!%p839_p9), %s884_s8, 32, %s192_s5, %s177_s27  }
  0x45   : > { %p996_p8 = scmp.ne.s32.totalorder %s995_s26, 0 }
  0x46   : > { %s202_s25 = sand.u32 (!%p996_p8), 1, %s738_s10   ;;  %p997_p11 = scmp.ne.s32.totalorder (!%p996_p8), %s993_s20, 0 }
  0x47   : > { %200 = sbr.rel (%p996_p8) target bundleno = 277 (0x115), region = 28  ;;  %s567_s28 = sshll.u32 (!%p996_p8), %s202_s25, 3 }
  0x48   : > { %s203_s4 = scalar_lea.sflag (!%p996_p8), [#allocation6], %s202_s25  ;;  %s206_s6 = scalar_lea.vmem (!%p996_p8), [#allocation5], %s567_s28 }
  0x4e   : > { %725 = dma.done.wait (%p997_p11), %s203_s4, 128  }
  0x4f   : > { %727 = vsyncadd (%p997_p11), %s203_s4, 4294967168  ;;  %s568_s7 = sshll.u32 %s202_s25, 1  ;;  %s212_s29 = scalar_lea.sflag [#allocation8], %s202_s25 }
  0x50   : > { %s215_s30 = scalar_lea.vmem [#allocation7], %s568_s7 }
  0x51   : > { %729 = dma.done.wait (%p997_p11), %s212_s29, 32  }
  0x52   : > { %731 = vsyncadd (%p997_p11), %s212_s29, 4294967264  ;;  %v760_v0 = vmov 0.0   ;;  %v917_v1 = vld [vmem:[%s206_s6] sm:$0x3]  ;;  %v919_v2 = vld [vmem:[%s206_s6 + $0x2] sm:$0x3] }
  0x53   : > { %260 = vst [vmem:[#allocation2] sm:$0xf] %v760_v0  ;;  %261 = vst [vmem:[#allocation3] sm:$0xf] %v760_v0  ;;  %v921_v3 = vld [vmem:[%s206_s6 + $0x4] sm:$0x3] }
  0x54   : > { %262 = vst [vmem:[#allocation4] sm:$0xf] %v760_v0  ;;  %v923_v4 = vld [vmem:[%s206_s6 + $0x6] sm:$0x3]  ;;  %v267_v5 = vld [vmem:[%s215_s30] sm:$0x3] }
  0x55   : > { %vm277_vm0 = vcmask 1041408   ;;  %vm268_vm1 = vcmp.eq.s32.totalorder %v267_v5, 0  ;;  %vm269_vm2 = vcmp.eq.s32.totalorder %v267_v5, 1  ;;  %vm270_vm3 = vcmp.eq.s32.totalorder %v267_v5, 2  ;;  %p249_p7 = scmp.lt.s32.totalorder %s746_s12, 1 }
  0x56   : > { %vm271_vm4 = vcmp.eq.s32.totalorder %v267_v5, 3  ;;  %v273_v6 = vsel %vm268_vm1, %v917_v1, 0.0  ;;  %v274_v7 = vsel %vm269_vm2, %v919_v2, 0.0  ;;  %v275_v8 = vsel %vm270_vm3, %v921_v3, 0.0 }
  0x57   : > { %v276_v9 = vsel %vm271_vm4, %v923_v4, 0.0  ;;  %v278_v10 = vsel %vm277_vm0, %v273_v6, 0.0  ;;  %v285_v11 = vsel %vm277_vm0, %v274_v7, 0.0  ;;  %v292_v12 = vsel %vm277_vm0, %v275_v8, 0.0  ;;  %s1006_s12 = smov (!%p249_p7, %s746_s12), 1 }
  0x58   : > { %v299_v13 = vsel %vm277_vm0, %v276_v9, 0.0  ;;  %v279_v14 = vrot.slane %v278_v10, 4  ;;  %v286_v15 = vrot.slane %v285_v11, 4  ;;  %v293_v16 = vrot.slane %v292_v12, 4  ;;  %s569_s20 = sshll.u32 %s1006_s12, 2 }
  0x59   : > { %v300_v17 = vrot.slane %v299_v13, 4  ;;  %vm310_vm5 = vcmask 1041409   ;;  %v570_v18 = vsel %vm268_vm1, 1.0, %v760_v0  ;;  %v571_v19 = vsel %vm269_vm2, 1.0, %v760_v0  ;;  %s255_s8 = scalar_lea.vmem %s990_s2, %s569_s20 }
  0x5a   : > { %v572_v20 = vsel %vm270_vm3, 1.0, %v760_v0  ;;  %v573_v21 = vsel %vm271_vm4, 1.0, %v760_v0  ;;  %v280_v22 = vadd.f32 %v279_v14, %v278_v10  ;;  %v287_v23 = vadd.f32 %v286_v15, %v285_v11  ;;  %v272_v62 = vld [vmem:[#allocation2] sm:$0xf] }
  0x5b   : > { %v294_v24 = vadd.f32 %v293_v16, %v292_v12  ;;  %v301_v25 = vadd.f32 %v300_v17, %v299_v13  ;;  %vm312_vm6 = vcmask 1042434   ;;  %vm314_vm7 = vcmask 1043459  }
  0x5c   : > { %v367_v26 = vsel %vm277_vm0, %v570_v18, 0.0  ;;  %v374_v27 = vsel %vm277_vm0, %v571_v19, 0.0  ;;  %v381_v28 = vsel %vm277_vm0, %v572_v20, 0.0  ;;  %v388_v29 = vsel %vm277_vm0, %v573_v21, 0.0 }
  0x5d   : > { %v281_v30 = vrot.slane %v280_v22, 2  ;;  %v288_v31 = vrot.slane %v287_v23, 2  ;;  %v295_v32 = vrot.slane %v294_v24, 2  ;;  %v302_v33 = vrot.slane %v301_v25, 2 }
  0x5e   : > { %v368_v34 = vrot.slane %v367_v26, 4  ;;  %v375_v35 = vrot.slane %v374_v27, 4  ;;  %v382_v36 = vrot.slane %v381_v28, 4  ;;  %v389_v37 = vrot.slane %v388_v29, 4 }
  0x5f   : > { %v282_v38 = vadd.f32 %v281_v30, %v280_v22  ;;  %v289_v39 = vadd.f32 %v288_v31, %v287_v23  ;;  %v296_v40 = vadd.f32 %v295_v32, %v294_v24  ;;  %v303_v41 = vadd.f32 %v302_v33, %v301_v25 }
  0x60   : > { %v369_v42 = vadd.f32 %v368_v34, %v367_v26  ;;  %v376_v43 = vadd.f32 %v375_v35, %v374_v27  ;;  %v383_v44 = vadd.f32 %v382_v36, %v381_v28  ;;  %v390_v45 = vadd.f32 %v389_v37, %v388_v29 }
  0x61   : > { %v283_v46 = vrot.slane %v282_v38, 1  ;;  %v290_v47 = vrot.slane %v289_v39, 1  ;;  %v297_v48 = vrot.slane %v296_v40, 1  ;;  %v304_v49 = vrot.slane %v303_v41, 1 }
  0x62   : > { %v370_v50 = vrot.slane %v369_v42, 2  ;;  %v377_v51 = vrot.slane %v376_v43, 2  ;;  %v384_v52 = vrot.slane %v383_v44, 2  ;;  %v391_v53 = vrot.slane %v390_v45, 2 }
  0x63   : > { %v284_v54 = vadd.f32 %v283_v46, %v282_v38  ;;  %v291_v55 = vadd.f32 %v290_v47, %v289_v39  ;;  %v298_v56 = vadd.f32 %v297_v48, %v296_v40  ;;  %v305_v57 = vadd.f32 %v304_v49, %v303_v41  ;;  %v319_v48 = vld [vmem:[#allocation3] sm:$0xf] }
  0x64   : > { %v371_v58 = vadd.f32 %v370_v50, %v369_v42  ;;  %v378_v59 = vadd.f32 %v377_v51, %v376_v43  ;;  %v385_v60 = vadd.f32 %v384_v52, %v383_v44  ;;  %v392_v61 = vadd.f32 %v391_v53, %v390_v45 }
  0x65   : > { %v311_v63 = vsel %vm310_vm5, %v291_v55, %v284_v54  ;;  %v320_v0 = vsel %vm277_vm0, %v917_v1, 0.0  ;;  %v327_v5 = vsel %vm277_vm0, %v919_v2, 0.0  ;;  %v334_v6 = vsel %vm277_vm0, %v921_v3, 0.0  ;;  %v358_v3 = vld [vmem:[#allocation4] sm:$0xf] }
  0x66   : > { %v313_v7 = vsel %vm312_vm6, %v298_v56, %v311_v63  ;;  %v372_v8 = vrot.slane %v371_v58, 1  ;;  %v379_v9 = vrot.slane %v378_v59, 1  ;;  %v386_v10 = vrot.slane %v385_v60, 1 }
  0x67   : > { %v315_v11 = vsel %vm314_vm7, %v305_v57, %v313_v7  ;;  %v393_v12 = vrot.slane %v392_v61, 1  ;;  %v321_v13 = vrot.slane %v320_v0, 4  ;;  %v328_v14 = vrot.slane %v327_v5, 4 }
  0x68   : > { %v317_v15 = vadd.f32 %v315_v11, %v272_v62  ;;  %v373_v16 = vadd.f32 %v372_v8, %v371_v58  ;;  %v380_v17 = vadd.f32 %v379_v9, %v378_v59  ;;  %v387_v1 = vadd.f32 %v386_v10, %v385_v60 }
  0x69   : > { %v394_v18 = vadd.f32 %v393_v12, %v392_v61  ;;  %v322_v19 = vadd.f32 %v321_v13, %v320_v0  ;;  %v329_v2 = vadd.f32 %v328_v14, %v327_v5  ;;  %v335_v20 = vrot.slane %v334_v6, 4 }
  0x6a   : > { %318 = vst [vmem:[#allocation2] sm:$0xf] %v317_v15  ;;  %v399_v21 = vsel %vm310_vm5, %v380_v17, %v373_v16  ;;  %v341_v22 = vsel %vm277_vm0, %v923_v4, 0.0  ;;  %vm409_vm8 = vcmask 1043456   ;;  %v414_v55 = vlaneseq }
  0x6b   : > { %v400_v23 = vsel %vm312_vm6, %v387_v1, %v399_v21  ;;  %v323_v24 = vrot.slane %v322_v19, 2  ;;  %v330_v25 = vrot.slane %v329_v2, 2  ;;  %v336_v26 = vadd.f32 %v335_v20, %v334_v6 }
  0x6c   : > { %v401_v27 = vsel %vm314_vm7, %v394_v18, %v400_v23  ;;  %v342_v28 = vrot.slane %v341_v22, 4  ;;  %v415_v56 = vand.u32 127, %v414_v55  ;;  %v417_v57 = vshrl.u32 %v414_v55, 7 }
  0x6d   : > { %v403_v29 = vadd.f32 %v401_v27, %v358_v3  ;;  %v324_v30 = vadd.f32 %v323_v24, %v322_v19  ;;  %v331_v31 = vadd.f32 %v330_v25, %v329_v2  ;;  %v337_v32 = vrot.slane %v336_v26, 2 }
  0x6e   : > { %v343_v33 = vadd.f32 %v342_v28, %v341_v22  ;;  %v418_v58 = vsub.s32 %v415_v56, %v417_v57  ;;  %vm421_vm9 = vcmask 24576  }
  0x6f   : > { %404 = vst [vmem:[#allocation4] sm:$0xf] %v403_v29  ;;  %v325_v34 = vrot.slane %v324_v30, 1  ;;  %v332_v35 = vrot.slane %v331_v31, 1  ;;  %v338_v36 = vadd.f32 %v337_v32, %v336_v26 }
  0x70   : > { %v344_v37 = vrot.slane %v343_v33, 2 }
  0x71   : > { %v408_v4 = vld [vmem:[#allocation2] sm:$0xf]  ;;  %v326_v38 = vadd.f32 %v325_v34, %v324_v30  ;;  %v333_v39 = vadd.f32 %v332_v35, %v331_v31  ;;  %v339_v40 = vrot.slane %v338_v36, 1 }
  0x72   : > { %v410_v41 = vsel %vm409_vm8, %v408_v4, 0.0  ;;  %v345_v42 = vadd.f32 %v344_v37, %v343_v33 }
  0x73   : > { %411 = vadd.xlane.f32.xlu0 %v410_v41  ;;  %v340_v43 = vadd.f32 %v339_v40, %v338_v36  ;;  %v352_v44 = vsel %vm310_vm5, %v333_v39, %v326_v38 }
  0x74   : > { %v346_v45 = vrot.slane %v345_v42, 1 }
  0x75   : > { %v353_v46 = vsel %vm312_vm6, %v340_v43, %v352_v44 }
  0x76   : > { %v434_v47 = vld [vmem:[#allocation4] sm:$0xf]  ;;  %v347_v49 = vadd.f32 %v346_v45, %v345_v42 }
  0x77   : > { %v435_v50 = vsel %vm409_vm8, %v434_v47, 0.0 }
  0x78   : > { %436 = vadd.xlane.f32.xlu1 %v435_v50  ;;  %v354_v51 = vsel %vm314_vm7, %v347_v49, %v353_v46 }
  0x79   : > { %v356_v52 = vadd.f32 %v354_v51, %v319_v48 }
  0x7b   : > { %357 = vst [vmem:[#allocation3] sm:$0xf] %v356_v52 }
  0x82   : > { %v423_v53 = vld [vmem:[#allocation3] sm:$0xf] }
  0x83   : > { %v424_v54 = vsel %vm409_vm8, %v423_v53, 0.0 }
  0x84   : > { %425 = vadd.xlane.f32.xlu0 %v424_v54 }
 0x100   : > { %v412_v59 = vpop.xlane.xlu0 %411 }
 0x101   : > { %v419_v60 = vrot.slane %v412_v59, %v418_v58 }
 0x103   : > { %422 = vst.msk [vmem:[%s255_s8] sm:$0x1] %vm421_vm9, %v419_v60 }
 0x105   : > { %v437_v61 = vpop.xlane.xlu1 %436 }
 0x106   : > { %v442_v62 = vrot.slane %v437_v61, %v418_v58 }
 0x108   : > { %444 = vst.msk [vmem:[%s255_s8 + $0x2] sm:$0x1] %vm421_vm9, %v442_v62 }
 0x111   : > { %v426_v63 = vpop.xlane.xlu0 %425 }
 0x112   : > { %v431_v0 = vrot.slane %v426_v63, %v418_v58 }
 0x114   : > { %433 = vst.msk [vmem:[%s255_s8 + $0x1] sm:$0x1] %vm421_vm9, %v431_v0 }
 0x115 PF: > { %s18_s14 = sadd.s32 1, %s754_s14   ;;  %s998_s9 = smov %s738_s10 }
 0x116   : > { %p15_p9 = scmp.ge.s32.totalorder %s18_s14, 4   ;;  %s999_s10 = smov %s742_s11 }
 0x117   : > { %s1000_s11 = smov %s825_s21  ;;  %s1001_s12 = smov %s750_s13 }
 0x118   : > { %s1002_s13 = smov %s1004_s16  ;;  %17 = sbr.rel (!%p15_p9) target bundleno = 6 (0x6), region = 89 }
 0x11f   :  { %470 = vsyncpa [#allocation6], 1 }
 0x120   :  { %472 = vsyncpa [#allocation6 + $0x1], 1 }
 0x121   :  { %473 = vsyncpa [#allocation8], 1 }
 0x122   :  { %475 = vsyncpa [#allocation8 + $0x1], 1 }

</bundles_post_ra>
